<compile_context>
chip_gen: v7x
topology: tpu7x:2x2x1
jax: 0.10.0
libtpu: 0.0.40
codegen_flags: <defaults>
</compile_context>

<pallas_src>
import functools

import jax
import jax.numpy as jnp
from jax.experimental import pallas as pl
from jax.experimental.pallas import tpu as pltpu

LANE = 128   # lane-dense padded feature width
EPS = 1e-5   # PyTorch BatchNorm1d default


# ----------------------------------------------------------------------------
# Single fused Pallas kernel: [Linear -> BN(batch stats) -> act] x num_layers
# ----------------------------------------------------------------------------
def _fused_mlp_kernel(x_ref, w_ref, gb_ref, o_ref, *, num_layers):
    h = x_ref[...]                                  # (B, LANE) f32, zero-padded
    for i in range(num_layers):                     # static unroll
        w = w_ref[i]                                # (LANE, LANE), pre-transposed, zero-padded
        gamma = gb_ref[2 * i:2 * i + 1, :]          # (1, LANE) lane-dense row
        beta = gb_ref[2 * i + 1:2 * i + 2, :]       # (1, LANE)

        # Linear on the MXU. Bias omitted: it cancels exactly against the
        # batch-mean subtraction of BatchNorm below. If the weight slab is
        # bf16, cast activations at the dot only; accumulate in f32.
        y = jnp.dot(h.astype(w.dtype), w, preferred_element_type=jnp.float32)

        # BatchNorm1d with batch statistics (track_running_stats=False),
        # biased variance, eps=1e-5 — two-pass variance for numerical safety.
        mean = jnp.mean(y, axis=0, keepdims=True)
        centered = y - mean
        var = jnp.mean(centered * centered, axis=0, keepdims=True)
        scale = gamma * jax.lax.rsqrt(var + EPS)    # gamma folded into scale
        y = centered * scale + beta

        if i < num_layers - 1:
            h = jnp.maximum(y, 0.0)                 # relu (hidden layers)
        else:
            h = jax.nn.sigmoid(y)                   # sigmoid (final layer)

    o_ref[...] = h                                  # lane-dense (B, LANE) store


# ----------------------------------------------------------------------------
# Jitted forward: the only per-call work is a fused pad + one pallas_call.
# Slabs are built ONCE (pack_params) and passed in as regular device arrays.
# ----------------------------------------------------------------------------
@functools.partial(jax.jit, static_argnames=("output_size",))
def solution_model_forward(x, w_slab, gb_slab, output_size):
    """x: (B, Fin). w_slab: (L, LANE, LANE). gb_slab: (2L, LANE)."""
    B, fin = x.shape
    num_layers = w_slab.shape[0]
    x_pad = jnp.pad(x.astype(jnp.float32), ((0, 0), (0, LANE - fin)))

    kernel = functools.partial(_fused_mlp_kernel, num_layers=num_layers)
    bytes_accessed = int(
        x_pad.size * 4
        + w_slab.size * w_slab.dtype.itemsize
        + gb_slab.size * 4
        + B * LANE * 4
    )
    cost = pl.CostEstimate(
        flops=int(2 * B * LANE * LANE * num_layers),
        transcendentals=int(B * LANE + num_layers * LANE),
        bytes_accessed=bytes_accessed,
    )

    # Whole problem is a few hundred KB -> no grid, single TensorCore; all
    # intermediates stay resident in VMEM/vregs.
    out = pl.pallas_call(
        kernel,
        out_shape=jax.ShapeDtypeStruct((B, LANE), jnp.float32),
        in_specs=[
            pl.BlockSpec(memory_space=pltpu.MemorySpace.VMEM),  # x_pad
            pl.BlockSpec(memory_space=pltpu.MemorySpace.VMEM),  # weight slab
            pl.BlockSpec(memory_space=pltpu.MemorySpace.VMEM),  # gamma/beta slab
        ],
        out_specs=pl.BlockSpec(memory_space=pltpu.MemorySpace.VMEM),
        cost_estimate=cost,
    )(x_pad, w_slab, gb_slab)
    return out[:, :output_size]


# ----------------------------------------------------------------------------
# Parameter init / one-time packing (plain JAX glue, NOT in the hot path)
# ----------------------------------------------------------------------------
def init_params(key, input_size, hidden_sizes, output_size):
    """Mirrors nn.Linear default init (U(-1/sqrt(fan_in), +1/sqrt(fan_in)))
    and BatchNorm1d default (gamma=1, beta=0). Bias kept only for the
    reference; the kernel drops it (mathematically cancelled by batch-stat BN)."""
    sizes = (input_size, *hidden_sizes, output_size)
    params = []
    for i in range(1, len(sizes)):
        fin, fout = sizes[i - 1], sizes[i]
        key, kw, kb = jax.random.split(key, 3)
        bound = 1.0 / (float(fin) ** 0.5)
        w_t = jax.random.uniform(kw, (fin, fout), jnp.float32, -bound, bound)
        b = jax.random.uniform(kb, (1, fout), jnp.float32, -bound, bound)
        gamma = jnp.ones((1, fout), jnp.float32)
        beta = jnp.zeros((1, fout), jnp.float32)
        params.append((w_t, b, gamma, beta))
    return params


def pack_params(params, *, weight_dtype=jnp.float32):
    """One-time packing: zero-pad each layer's (Fin, Fout) weight into a
    (LANE, LANE) slice; stack gamma/beta as interleaved rows of a flat
    (2L, LANE) slab. Call once at init; the slabs are reused every forward.

    weight_dtype=jnp.bfloat16 halves the weight DMA and uses the native bf16
    MXU path, but may not meet a 1e-4 allclose vs an f32 reference."""
    num_layers = len(params)
    w_slab = jnp.zeros((num_layers, LANE, LANE), jnp.float32)
    gb_slab = jnp.zeros((2 * num_layers, LANE), jnp.float32)
    gb_slab = gb_slab.at[0::2, :].set(1.0)  # gamma rows default to 1 (beta rows 0)
    for i, (w_t, _b, gamma, beta) in enumerate(params):
        fin, fout = w_t.shape
        w_slab = w_slab.at[i, :fin, :fout].set(w_t)
        gb_slab = gb_slab.at[2 * i, :fout].set(gamma[0])
        gb_slab = gb_slab.at[2 * i + 1, :fout].set(beta[0])
    return w_slab.astype(weight_dtype), gb_slab


# ----------------------------------------------------------------------------
# Pure-JAX reference (with the Linear bias, two-pass variance) for checking
# ----------------------------------------------------------------------------
def reference_forward(x, params):
    n = len(params)
    for idx, (w_t, b, gamma, beta) in enumerate(params):
        y = x @ w_t + b
        mean = jnp.mean(y, axis=0, keepdims=True)
        var = jnp.mean((y - mean) ** 2, axis=0, keepdims=True)
        y = (y - mean) / jnp.sqrt(var + EPS)
        y = y * gamma + beta
        x = jnp.maximum(y, 0.0) if idx < n - 1 else jax.nn.sigmoid(y)
    return x


if __name__ == "__main__":
    key = jax.random.PRNGKey(0)
    batch = 8
    input_size = 32
    hidden_sizes = (32, 16)
    output_size = 8

    kx, kp = jax.random.split(key)
    x = jax.random.normal(kx, (batch, input_size), jnp.float32)
    params = init_params(kp, input_size, hidden_sizes, output_size)

    # Hoisted out of the hot path: pack once, reuse on every forward call.
    # (Switch weight_dtype=jnp.bfloat16 if the accuracy budget allows it.)
    w_slab, gb_slab = pack_params(params, weight_dtype=jnp.float32)
    w_slab = jax.block_until_ready(w_slab)
    gb_slab = jax.block_until_ready(gb_slab)

    out = solution_model_forward(x, w_slab, gb_slab, output_size)
    out = jax.block_until_ready(out)

    ref = reference_forward(x, params)
    assert out.shape == (batch, output_size)
    assert jnp.allclose(out, ref, atol=1e-4, rtol=1e-4), "mismatch vs reference"

    print("KERNEL_OK")
</pallas_src>

<mosaic_0001>
module attributes {stable_mosaic.version = 11 : i64} {
  func.func @_fused_mlp_kernel(%arg0: memref<8x128xf32, #tpu.memory_space<vmem>>, %arg1: memref<3x128x128xf32, #tpu.memory_space<vmem>>, %arg2: memref<6x128xf32, #tpu.memory_space<vmem>>, %arg3: memref<8x128xf32, #tpu.memory_space<vmem>>) attributes {dimension_semantics = [], scalar_prefetch = 0 : i64, scratch_operands = 0 : i64, tpu.core_type = #tpu.core_type<tc>} {
    %c0 = arith.constant 0 : index
    %c0_0 = arith.constant 0 : index
    %0 = vector.load %arg0[%c0, %c0_0] : memref<8x128xf32, #tpu.memory_space<vmem>>, vector<8x128xf32>
    %c0_1 = arith.constant 0 : index
    %c0_2 = arith.constant 0 : index
    %c0_3 = arith.constant 0 : index
    %1 = vector.load %arg1[%c0_1, %c0_2, %c0_3] : memref<3x128x128xf32, #tpu.memory_space<vmem>>, vector<1x128x128xf32>
    %2 = vector.shape_cast %1 : vector<1x128x128xf32> to vector<128x128xf32>
    %c0_4 = arith.constant 0 : index
    %c0_5 = arith.constant 0 : index
    %3 = vector.load %arg2[%c0_4, %c0_5] : memref<6x128xf32, #tpu.memory_space<vmem>>, vector<1x128xf32>
    %c1 = arith.constant 1 : index
    %c0_6 = arith.constant 0 : index
    %4 = vector.load %arg2[%c1, %c0_6] : memref<6x128xf32, #tpu.memory_space<vmem>>, vector<1x128xf32>
    %cst = arith.constant dense<0.000000e+00> : vector<8x128xf32>
    %5 = tpu.matmul %0, %2, %cst {dimension_numbers = #tpu.dot_dimension_numbers<[1], [0], [0], [1], [0, 0, 1, 1], [], []>} : vector<8x128xf32>, vector<128x128xf32>, vector<8x128xf32> -> vector<8x128xf32>
    %cst_7 = arith.constant dense<0.000000e+00> : vector<128xf32>
    %6 = vector.multi_reduction <add>, %5, %cst_7 [0] : vector<8x128xf32> to vector<128xf32>
    %7 = vector.shape_cast %6 : vector<128xf32> to vector<1x128xf32>
    %cst_8 = arith.constant 8.000000e+00 : f32
    %8 = vector.broadcast %cst_8 : f32 to vector<1x128xf32>
    %9 = arith.divf %7, %8 : vector<1x128xf32>
    %10 = vector.broadcast %9 : vector<1x128xf32> to vector<8x128xf32>
    %11 = arith.subf %5, %10 : vector<8x128xf32>
    %12 = arith.mulf %11, %11 : vector<8x128xf32>
    %cst_9 = arith.constant dense<0.000000e+00> : vector<128xf32>
    %13 = vector.multi_reduction <add>, %12, %cst_9 [0] : vector<8x128xf32> to vector<128xf32>
    %14 = vector.shape_cast %13 : vector<128xf32> to vector<1x128xf32>
    %cst_10 = arith.constant 8.000000e+00 : f32
    %15 = vector.broadcast %cst_10 : f32 to vector<1x128xf32>
    %16 = arith.divf %14, %15 : vector<1x128xf32>
    %cst_11 = arith.constant 9.99999974E-6 : f32
    %17 = vector.broadcast %cst_11 : f32 to vector<1x128xf32>
    %18 = arith.addf %16, %17 : vector<1x128xf32>
    %19 = math.rsqrt %18 : vector<1x128xf32>
    %20 = arith.mulf %3, %19 : vector<1x128xf32>
    %21 = vector.broadcast %20 : vector<1x128xf32> to vector<8x128xf32>
    %22 = arith.mulf %11, %21 : vector<8x128xf32>
    %23 = vector.broadcast %4 : vector<1x128xf32> to vector<8x128xf32>
    %24 = arith.addf %22, %23 : vector<8x128xf32>
    %cst_12 = arith.constant 0.000000e+00 : f32
    %25 = vector.broadcast %cst_12 : f32 to vector<8x128xf32>
    %26 = arith.maximumf %24, %25 : vector<8x128xf32>
    %c1_13 = arith.constant 1 : index
    %c0_14 = arith.constant 0 : index
    %c0_15 = arith.constant 0 : index
    %27 = vector.load %arg1[%c1_13, %c0_14, %c0_15] : memref<3x128x128xf32, #tpu.memory_space<vmem>>, vector<1x128x128xf32>
    %28 = vector.shape_cast %27 : vector<1x128x128xf32> to vector<128x128xf32>
    %c2 = arith.constant 2 : index
    %c0_16 = arith.constant 0 : index
    %29 = vector.load %arg2[%c2, %c0_16] : memref<6x128xf32, #tpu.memory_space<vmem>>, vector<1x128xf32>
    %c3 = arith.constant 3 : index
    %c0_17 = arith.constant 0 : index
    %30 = vector.load %arg2[%c3, %c0_17] : memref<6x128xf32, #tpu.memory_space<vmem>>, vector<1x128xf32>
    %cst_18 = arith.constant dense<0.000000e+00> : vector<8x128xf32>
    %31 = tpu.matmul %26, %28, %cst_18 {dimension_numbers = #tpu.dot_dimension_numbers<[1], [0], [0], [1], [0, 0, 1, 1], [], []>} : vector<8x128xf32>, vector<128x128xf32>, vector<8x128xf32> -> vector<8x128xf32>
    %cst_19 = arith.constant dense<0.000000e+00> : vector<128xf32>
    %32 = vector.multi_reduction <add>, %31, %cst_19 [0] : vector<8x128xf32> to vector<128xf32>
    %33 = vector.shape_cast %32 : vector<128xf32> to vector<1x128xf32>
    %cst_20 = arith.constant 8.000000e+00 : f32
    %34 = vector.broadcast %cst_20 : f32 to vector<1x128xf32>
    %35 = arith.divf %33, %34 : vector<1x128xf32>
    %36 = vector.broadcast %35 : vector<1x128xf32> to vector<8x128xf32>
    %37 = arith.subf %31, %36 : vector<8x128xf32>
    %38 = arith.mulf %37, %37 : vector<8x128xf32>
    %cst_21 = arith.constant dense<0.000000e+00> : vector<128xf32>
    %39 = vector.multi_reduction <add>, %38, %cst_21 [0] : vector<8x128xf32> to vector<128xf32>
    %40 = vector.shape_cast %39 : vector<128xf32> to vector<1x128xf32>
    %cst_22 = arith.constant 8.000000e+00 : f32
    %41 = vector.broadcast %cst_22 : f32 to vector<1x128xf32>
    %42 = arith.divf %40, %41 : vector<1x128xf32>
    %cst_23 = arith.constant 9.99999974E-6 : f32
    %43 = vector.broadcast %cst_23 : f32 to vector<1x128xf32>
    %44 = arith.addf %42, %43 : vector<1x128xf32>
    %45 = math.rsqrt %44 : vector<1x128xf32>
    %46 = arith.mulf %29, %45 : vector<1x128xf32>
    %47 = vector.broadcast %46 : vector<1x128xf32> to vector<8x128xf32>
    %48 = arith.mulf %37, %47 : vector<8x128xf32>
    %49 = vector.broadcast %30 : vector<1x128xf32> to vector<8x128xf32>
    %50 = arith.addf %48, %49 : vector<8x128xf32>
    %cst_24 = arith.constant 0.000000e+00 : f32
    %51 = vector.broadcast %cst_24 : f32 to vector<8x128xf32>
    %52 = arith.maximumf %50, %51 : vector<8x128xf32>
    %c2_25 = arith.constant 2 : index
    %c0_26 = arith.constant 0 : index
    %c0_27 = arith.constant 0 : index
    %53 = vector.load %arg1[%c2_25, %c0_26, %c0_27] : memref<3x128x128xf32, #tpu.memory_space<vmem>>, vector<1x128x128xf32>
    %54 = vector.shape_cast %53 : vector<1x128x128xf32> to vector<128x128xf32>
    %c4 = arith.constant 4 : index
    %c0_28 = arith.constant 0 : index
    %55 = vector.load %arg2[%c4, %c0_28] : memref<6x128xf32, #tpu.memory_space<vmem>>, vector<1x128xf32>
    %c5 = arith.constant 5 : index
    %c0_29 = arith.constant 0 : index
    %56 = vector.load %arg2[%c5, %c0_29] : memref<6x128xf32, #tpu.memory_space<vmem>>, vector<1x128xf32>
    %cst_30 = arith.constant dense<0.000000e+00> : vector<8x128xf32>
    %57 = tpu.matmul %52, %54, %cst_30 {dimension_numbers = #tpu.dot_dimension_numbers<[1], [0], [0], [1], [0, 0, 1, 1], [], []>} : vector<8x128xf32>, vector<128x128xf32>, vector<8x128xf32> -> vector<8x128xf32>
    %cst_31 = arith.constant dense<0.000000e+00> : vector<128xf32>
    %58 = vector.multi_reduction <add>, %57, %cst_31 [0] : vector<8x128xf32> to vector<128xf32>
    %59 = vector.shape_cast %58 : vector<128xf32> to vector<1x128xf32>
    %cst_32 = arith.constant 8.000000e+00 : f32
    %60 = vector.broadcast %cst_32 : f32 to vector<1x128xf32>
    %61 = arith.divf %59, %60 : vector<1x128xf32>
    %62 = vector.broadcast %61 : vector<1x128xf32> to vector<8x128xf32>
    %63 = arith.subf %57, %62 : vector<8x128xf32>
    %64 = arith.mulf %63, %63 : vector<8x128xf32>
    %cst_33 = arith.constant dense<0.000000e+00> : vector<128xf32>
    %65 = vector.multi_reduction <add>, %64, %cst_33 [0] : vector<8x128xf32> to vector<128xf32>
    %66 = vector.shape_cast %65 : vector<128xf32> to vector<1x128xf32>
    %cst_34 = arith.constant 8.000000e+00 : f32
    %67 = vector.broadcast %cst_34 : f32 to vector<1x128xf32>
    %68 = arith.divf %66, %67 : vector<1x128xf32>
    %cst_35 = arith.constant 9.99999974E-6 : f32
    %69 = vector.broadcast %cst_35 : f32 to vector<1x128xf32>
    %70 = arith.addf %68, %69 : vector<1x128xf32>
    %71 = math.rsqrt %70 : vector<1x128xf32>
    %72 = arith.mulf %55, %71 : vector<1x128xf32>
    %73 = vector.broadcast %72 : vector<1x128xf32> to vector<8x128xf32>
    %74 = arith.mulf %63, %73 : vector<8x128xf32>
    %75 = vector.broadcast %56 : vector<1x128xf32> to vector<8x128xf32>
    %76 = arith.addf %74, %75 : vector<8x128xf32>
    %77 = arith.negf %76 : vector<8x128xf32>
    %78 = math.exp %77 : vector<8x128xf32>
    %cst_36 = arith.constant 1.000000e+00 : f32
    %79 = vector.broadcast %cst_36 : f32 to vector<8x128xf32>
    %80 = arith.addf %79, %78 : vector<8x128xf32>
    %81 = arith.divf %79, %80 : vector<8x128xf32>
    %c0_37 = arith.constant 0 : index
    %c0_38 = arith.constant 0 : index
    %82 = vector.load %arg3[%c0_37, %c0_38] : memref<8x128xf32, #tpu.memory_space<vmem>>, vector<8x128xf32>
    tpu.vector_store %arg3[%c0_37, %c0_38], %81 {strides = array<i32>} : memref<8x128xf32, #tpu.memory_space<vmem>>, vector<8x128xf32>,
    return
  }
}

</mosaic_0001>

<bundles_post_ra>
// kernel: solution_model_forward.1
= control target key start
LH: loop header
LB: loop body
LE: loop exit
PB: predicated region body
PF: predicated region fallthrough
CT: control target
= control target key end

     0   :  { %8 = vsyncpa [#allocation3], 0  ;;  %s809_s0 = inlined_call_operand.vmem [shape: f32[8,128], index: 0, kind: input, shape index: {}]   ;;  %s810_s1 = inlined_call_operand.hbm [shape: f32[3,128,128], index: 1, kind: input, shape index: {}]   ;;  %s811_s2 = inlined_call_operand.vmem [shape: f32[6,128], index: 2, kind: input, shape index: {}]   ;;  %s812_s3 = inlined_call_operand.hbm [shape: f32[8,128], index: 3, kind: output, shape index: {}]  }
   0x1   :  { %9 = vsyncpa [#allocation4], 0  ;;  %s705_s12 = smov [#allocation2]   ;;  %s657_s16 = scalar_lea.hbm %s810_s1, 6144 }
   0x2   :  { %s17_s13 = sshll.u32 %s705_s12, 4  ;;  %p658_p0 = scmp.ne.s32.totalorder %s810_s1, %s657_s16  ;;  %s18_s13 = int_to_ptr.vmem [resolvable:$true] %s17_s13 }
   0x3   :  { %p661_p1 = scmp.lt.u32.totalorder %s657_s16, %s810_s1 }
   0x5   :  { %p663_p2 = pnand %p661_p1, %p658_p0 }
   0x7   :  { %666 = shalt.err (!%p663_p2)
}
   0x8   :  { %s667_s21 = scalar_lea.vmem %s18_s13, 6144  ;;  %p672_p4 = scmp.lt.s32.totalorder %s18_s13, %s18_s13 }
   0x9   :  { %p668_p3 = scmp.ne.s32.totalorder %s18_s13, %s667_s21  ;;  %p673_p5 = scmp.lt.s32.totalorder %s667_s21, %s667_s21 }
   0xb   :  { %p674_p6 = por %p673_p5, %p672_p4 }
   0xd   :  { %p675_p7 = pnand %p674_p6, %p668_p3 }
   0xf   :  { %678 = shalt.err (!%p675_p7)
}
  0x10   :  { %s706_s22 = smov 128   ;;  %s707_s23 = smov 8  }
  0x11   :  { %23 = dma.hbm_to_vmem [thread:$0]  %s810_s1, 6144, %s18_s13, [#allocation3], %s706_s22, %s706_s22, %s707_s23  }
  0x12   :  { %701 = dma.done.wait [#allocation3], 6144  }
  0x13   :  { %702 = vsyncadd [#allocation3], 4294961152  ;;  %v708_v0 = vmov 0.0|0.0   ;;  %vm709_vm0 = vmmov 0   ;;  %v710_v1 = vmov 0.0   ;;  %v30_v2 = vld [vmem:[#allocation2] sm:$0xff] }
  0x14   :  { %568 = vmatprep.subr.bf16.mxu0 %v708_v0  ;;  %495 = vmatprep.mubr.msk.f32.mxu0 %vm709_vm0, %v710_v1  ;;  %v31_v3 = vld [vmem:[#allocation2 + $0x8] sm:$0xff]  ;;  %v32_v4 = vld [vmem:[#allocation2 + $0x10] sm:$0xff]  ;;  %v33_v6 = vld [vmem:[#allocation2 + $0x18] sm:$0xff]  ;;  %s711_s11 = smov [#allocation5]  }
  0x15   :  { %592 = vmatprep.subr.bf16.mxu1 %v708_v0  ;;  %530 = vmatprep.mubr.msk.f32.mxu1 %vm709_vm0, %v710_v1  ;;  %v569_v5 = vpack.c.bf16 %v31_v3, %v30_v2  ;;  %v572_v7 = vpack.c.bf16 %v33_v6, %v32_v4  ;;  %v34_v8 = vld [vmem:[#allocation2 + $0x20] sm:$0xff]  ;;  %v35_v9 = vld [vmem:[#allocation2 + $0x28] sm:$0xff]  ;;  %v36_v11 = vld [vmem:[#allocation2 + $0x30] sm:$0xff]  ;;  %s399_s12 = sshll.u32 %s711_s11, 4  ;;  %s400_s12 = int_to_ptr.vmem [resolvable:$true] %s399_s12 }
  0x16   :  { %v575_v10 = vpack.c.bf16 %v35_v9, %v34_v8  ;;  %v37_v12 = vld [vmem:[#allocation2 + $0x38] sm:$0xff]  ;;  %v38_v14 = vld [vmem:[#allocation2 + $0x40] sm:$0xff]  ;;  %v39_v15 = vld [vmem:[#allocation2 + $0x48] sm:$0xff]  ;;  %s679_s13 = scalar_lea.vmem %s400_s12, 128  ;;  %p684_p9 = scmp.lt.s32.totalorder %s400_s12, %s400_s12 }
  0x17   :  { %570 = vmatpush3.bf16.msra.mxu0 %v569_v5  ;;  %v578_v13 = vpack.c.bf16 %v37_v12, %v36_v11  ;;  %v581_v16 = vpack.c.bf16 %v39_v15, %v38_v14  ;;  %v40_v17 = vld [vmem:[#allocation2 + $0x50] sm:$0xff]  ;;  %v41_v18 = vld [vmem:[#allocation2 + $0x58] sm:$0xff]  ;;  %v42_v20 = vld [vmem:[#allocation2 + $0x60] sm:$0xff]  ;;  %p680_p8 = scmp.ne.s32.totalorder %s400_s12, %s679_s13  ;;  %p685_p10 = scmp.lt.s32.totalorder %s679_s13, %s679_s13 }
  0x18   :  { %571 = vmatprep.subr.bf16.mxu0 %v708_v0  ;;  %v584_v19 = vpack.c.bf16 %v41_v18, %v40_v17  ;;  %v43_v21 = vld [vmem:[#allocation2 + $0x68] sm:$0xff]  ;;  %v44_v23 = vld [vmem:[#allocation2 + $0x70] sm:$0xff]  ;;  %v45_v24 = vld [vmem:[#allocation2 + $0x78] sm:$0xff] }
  0x19   :  { %v587_v22 = vpack.c.bf16 %v43_v21, %v42_v20  ;;  %v590_v25 = vpack.c.bf16 %v45_v24, %v44_v23  ;;  %v29_v26 = vld [vmem:[%s809_s0] sm:$0xff]  ;;  %v150_v27 = vld [vmem:[#allocation2 + $0x80] sm:$0xff]  ;;  %v151_v28 = vld [vmem:[#allocation2 + $0x88] sm:$0xff]  ;;  %p686_p11 = por %p685_p10, %p684_p9 }
  0x1a   :  { %v593_v29 = vpack.c.bf16 %v151_v28, %v150_v27  ;;  %v152_v30 = vld [vmem:[#allocation2 + $0x90] sm:$0xff]  ;;  %v153_v31 = vld [vmem:[#allocation2 + $0x98] sm:$0xff]  ;;  %v154_v33 = vld [vmem:[#allocation2 + $0xa0] sm:$0xff] }
  0x1b   :  { %573 = vmatpush3.bf16.msra.mxu0 %v572_v7  ;;  %v596_v32 = vpack.c.bf16 %v153_v31, %v152_v30  ;;  %v155_v34 = vld [vmem:[#allocation2 + $0xa8] sm:$0xff]  ;;  %v156_v36 = vld [vmem:[#allocation2 + $0xb0] sm:$0xff]  ;;  %v157_v37 = vld [vmem:[#allocation2 + $0xb8] sm:$0xff]  ;;  %v138_v7 = vlaneseq  ;;  %p687_p12 = pnand %p686_p11, %p680_p8 }
  0x1c   :  { %574 = vmatprep.subr.bf16.mxu0 %v708_v0  ;;  %594 = vmatpush3.bf16.msra.mxu1 %v593_v29  ;;  %v599_v35 = vpack.c.bf16 %v155_v34, %v154_v33  ;;  %v602_v38 = vpack.c.bf16 %v157_v37, %v156_v36  ;;  %v158_v39 = vld [vmem:[#allocation2 + $0xc0] sm:$0xff]  ;;  %v159_v40 = vld [vmem:[#allocation2 + $0xc8] sm:$0xff]  ;;  %v160_v42 = vld [vmem:[#allocation2 + $0xd0] sm:$0xff] }
  0x1d   :  { %595 = vmatprep.subr.bf16.mxu1 %v708_v0  ;;  %v605_v41 = vpack.c.bf16 %v159_v40, %v158_v39  ;;  %v161_v43 = vld [vmem:[#allocation2 + $0xd8] sm:$0xff]  ;;  %v162_v45 = vld [vmem:[#allocation2 + $0xe0] sm:$0xff]  ;;  %v163_v46 = vld [vmem:[#allocation2 + $0xe8] sm:$0xff]  ;;  %v139_v8 = vshrl.u32 %v138_v7, 7 }
  0x1e   :  { %v608_v44 = vpack.c.bf16 %v161_v43, %v160_v42  ;;  %v611_v47 = vpack.c.bf16 %v163_v46, %v162_v45  ;;  %v164_v48 = vld [vmem:[#allocation2 + $0xf0] sm:$0xff]  ;;  %v165_v49 = vld [vmem:[#allocation2 + $0xf8] sm:$0xff]  ;;  %v269_v18 = vld [vmem:[#allocation2 + $0x100] sm:$0xff] }
  0x1f   :  { %576 = vmatpush3.bf16.msra.mxu0 %v575_v10  ;;  %v614_v50 = vpack.c.bf16 %v165_v49, %v164_v48  ;;  %v46_v9 = vld [vmem:[%s811_s2] sm:$0x1]  ;;  %v770_v10 = vsub.s32 0, %v139_v8  ;;  %v408_v14 = vld [vmem:[%s811_s2 + $0x1] ss:$0 sm:$0xff]  ;;  %v273_v24 = vld [vmem:[#allocation2 + $0x120] sm:$0xff] }
  0x20   :  { %577 = vmatprep.subr.bf16.mxu0 %v708_v0  ;;  %597 = vmatpush3.bf16.msra.mxu1 %v596_v32  ;;  %v271_v21 = vld [vmem:[#allocation2 + $0x110] sm:$0xff]  ;;  %v276_v28 = vld [vmem:[#allocation2 + $0x138] sm:$0xff]  ;;  %v277_v30 = vld [vmem:[#allocation2 + $0x140] sm:$0xff] }
  0x21   :  { %598 = vmatprep.subr.bf16.mxu1 %v708_v0  ;;  %v275_v27 = vld [vmem:[#allocation2 + $0x130] sm:$0xff]  ;;  %v278_v31 = vld [vmem:[#allocation2 + $0x148] sm:$0xff]  ;;  %v280_v34 = vld [vmem:[#allocation2 + $0x158] sm:$0xff] }
  0x22   :  { %v626_v29 = vpack.c.bf16 %v276_v28, %v275_v27  ;;  %v629_v32 = vpack.c.bf16 %v278_v31, %v277_v30  ;;  %v279_v33 = vld [vmem:[#allocation2 + $0x150] sm:$0xff]  ;;  %v281_v36 = vld [vmem:[#allocation2 + $0x160] sm:$0xff]  ;;  %v282_v37 = vld [vmem:[#allocation2 + $0x168] sm:$0xff] }
  0x23   :  { %579 = vmatpush3.bf16.msra.mxu0 %v578_v13  ;;  %v283_v39 = vld [vmem:[#allocation2 + $0x170] sm:$0xff]  ;;  %v284_v40 = vld [vmem:[#allocation2 + $0x178] sm:$0xff] }
  0x24   :  { %580 = vmatprep.subr.bf16.mxu0 %v708_v0  ;;  %600 = vmatpush3.bf16.msra.mxu1 %v599_v35  ;;  %v632_v35 = vpack.c.bf16 %v280_v34, %v279_v33 }
  0x25   :  { %601 = vmatprep.subr.bf16.mxu1 %v708_v0 }
  0x27   :  { %582 = vmatpush3.bf16.msra.mxu0 %v581_v16 }
  0x28   :  { %583 = vmatprep.subr.bf16.mxu0 %v708_v0  ;;  %603 = vmatpush3.bf16.msra.mxu1 %v602_v38  ;;  %v635_v38 = vpack.c.bf16 %v282_v37, %v281_v36 }
  0x29   :  { %604 = vmatprep.subr.bf16.mxu1 %v708_v0 }
  0x2b   :  { %585 = vmatpush3.bf16.msra.mxu0 %v584_v19  ;;  %v270_v19 = vld [vmem:[#allocation2 + $0x108] sm:$0xff] }
  0x2c   :  { %586 = vmatprep.subr.bf16.mxu0 %v708_v0  ;;  %606 = vmatpush3.bf16.msra.mxu1 %v605_v41  ;;  %v617_v20 = vpack.c.bf16 %v270_v19, %v269_v18  ;;  %v638_v41 = vpack.c.bf16 %v284_v40, %v283_v39 }
  0x2d   :  { %607 = vmatprep.subr.bf16.mxu1 %v708_v0 }
  0x2f   :  { %588 = vmatpush3.bf16.msra.mxu0 %v587_v22  ;;  %v272_v22 = vld [vmem:[#allocation2 + $0x118] sm:$0xff] }
  0x30   :  { %589 = vmatprep.subr.bf16.mxu0 %v708_v0  ;;  %609 = vmatpush3.bf16.msra.mxu1 %v608_v44  ;;  %v620_v23 = vpack.c.bf16 %v272_v22, %v271_v21 }
  0x31   :  { %610 = vmatprep.subr.bf16.mxu1 %v708_v0 }
  0x33   :  { %591 = vmatpush3.bf16.msra.mxu0 %v590_v25  ;;  %v274_v25 = vld [vmem:[#allocation2 + $0x128] sm:$0xff] }
  0x34   :  { %616 = vmatprep.subr.bf16.mxu0 %v708_v0  ;;  %612 = vmatpush3.bf16.msra.mxu1 %v611_v47 }
  0x35   :  { %613 = vmatprep.subr.bf16.mxu1 %v708_v0 }
  0x36   :  { %496 = vmatmul.mubr.f32.vlgmr.msra.gmra.mrb[0].mxu0 %v29_v26  ;;  %v623_v26 = vpack.c.bf16 %v274_v25, %v273_v24  ;;  %v285_v25 = vld [vmem:[%s811_s2 + $0x4] sm:$0x1] }
  0x37   :  { %565 = vmatprep.mubr.msk.f32.mxu0 %vm709_vm0, %v710_v1  ;;  %618 = vmatpush3.bf16.msra.mxu0 %v617_v20 }
  0x38   :  { %615 = vmatpush3.bf16.msra.mxu1 %v614_v50  ;;  %619 = vmatprep.subr.bf16.mxu0 %v708_v0 }
  0x3b   :  { %621 = vmatpush3.bf16.msra.mxu0 %v620_v23 }
  0x3c   :  { %622 = vmatprep.subr.bf16.mxu0 %v708_v0 }
  0x3f   :  { %624 = vmatpush3.bf16.msra.mxu0 %v623_v26 }
  0x40   :  { %625 = vmatprep.subr.bf16.mxu0 %v708_v0 }
  0x43   :  { %627 = vmatpush3.bf16.msra.mxu0 %v626_v29  ;;  %v410_v29 = vld [vmem:[%s811_s2 + $0x5] ss:$0 sm:$0xff] }
  0x44   :  { %628 = vmatprep.subr.bf16.mxu0 %v708_v0 }
  0x47   :  { %630 = vmatpush3.bf16.msra.mxu0 %v629_v32 }
  0x48   :  { %631 = vmatprep.subr.bf16.mxu0 %v708_v0 }
  0x4b   :  { %633 = vmatpush3.bf16.msra.mxu0 %v632_v35 }
  0x4c   :  { %634 = vmatprep.subr.bf16.mxu0 %v708_v0 }
  0x4f   :  { %636 = vmatpush3.bf16.msra.mxu0 %v635_v38 }
  0x50   :  { %637 = vmatprep.subr.bf16.mxu0 %v708_v0 }
  0x53   :  { %639 = vmatpush3.bf16.msra.mxu0 %v638_v41 }
 0x109   :  { %v114_v51 = vpop.f32.mrb[0].mxu0 }
 0x10a   :  { %v118_v52 = vrot.slane %v114_v51, 4  ;;  %v497_v53 = vpop.f32.mrb[1].mxu0 }
 0x10c   :  { %v119_v54 = vadd.f32 %v118_v52, %v114_v51 }
 0x10e   :  { %v120_v55 = vrot.slane %v119_v54, 2 }
 0x110   :  { %v121_v56 = vadd.f32 %v120_v55, %v119_v54 }
 0x112   :  { %v122_v57 = vrot.slane %v121_v56, 1 }
 0x114   :  { %v123_v58 = vadd.f32 %v122_v57, %v121_v56 }
 0x116   :  { %v125_v59 = vmul.f32 0.125, %v123_v58 }
 0x118   :  { %v126_v60 = vsub.f32 %v114_v51, %v125_v59 }
 0x11a   :  { %v127_v61 = vmul.f32 %v126_v60, %v126_v60 }
 0x11c   :  { %v128_v62 = vrot.slane %v127_v61, 4 }
 0x11e   :  { %v129_v63 = vadd.f32 %v128_v62, %v127_v61 }
 0x120   :  { %v130_v1 = vrot.slane %v129_v63, 2 }
 0x122   :  { %v131_v2 = vadd.f32 %v130_v1, %v129_v63  ;;  %v409_v1 = vld [vmem:[%s811_s2 + $0x3] ss:$0 sm:$0xff] }
 0x124   :  { %v132_v3 = vrot.slane %v131_v2, 1 }
 0x126   :  { %v133_v4 = vadd.f32 %v132_v3, %v131_v2 }
 0x128   :  { %v134_v5 = vmul.f32 0.125, %v133_v4 }
 0x12a   :  { %v135_v6 = vadd.f32 1e-05, %v134_v5 }
 0x12c   :  { %647 = vrsqrt.f32 %v135_v6 }
 0x136   :  { %v648_v11 = vpop.eup %647 }
 0x137   :  { %v137_v12 = vmul.f32 %v648_v11, %v46_v9 }
 0x139   :  { %v141_v13 = vrot.slane %v137_v12, %v770_v10 }
 0x13b   :  { %v142_v15 = vmul.f32 %v141_v13, %v126_v60  ;;  %v166_v60 = vld [vmem:[%s811_s2 + $0x2] sm:$0x1] }
 0x13d   :  { %v147_v16 = vadd.f32 %v408_v14, %v142_v15 }
 0x13f   :  { %v148_v17 = vmax.f32 %v147_v16, 0.0 }
 0x141   :  { %531 = vmatmul.mubr.f32.vlgmr.msra.gmra.mrb[0].mxu1 %v148_v17 }
 0x214   :  { %v234_v42 = vpop.f32.mrb[0].mxu1 }
 0x215   :  { %v238_v43 = vrot.slane %v234_v42, 4  ;;  %v532_v44 = vpop.f32.mrb[1].mxu1 }
 0x217   :  { %v239_v45 = vadd.f32 %v238_v43, %v234_v42 }
 0x219   :  { %v240_v46 = vrot.slane %v239_v45, 2 }
 0x21b   :  { %v241_v47 = vadd.f32 %v240_v46, %v239_v45 }
 0x21d   :  { %v242_v48 = vrot.slane %v241_v47, 1 }
 0x21f   :  { %v243_v49 = vadd.f32 %v242_v48, %v241_v47 }
 0x221   :  { %v244_v50 = vmul.f32 0.125, %v243_v49 }
 0x223   :  { %v245_v51 = vsub.f32 %v234_v42, %v244_v50 }
 0x225   :  { %v246_v52 = vmul.f32 %v245_v51, %v245_v51 }
 0x227   :  { %v247_v53 = vrot.slane %v246_v52, 4 }
 0x229   :  { %v248_v54 = vadd.f32 %v247_v53, %v246_v52 }
 0x22b   :  { %v249_v55 = vrot.slane %v248_v54, 2 }
 0x22d   :  { %v250_v56 = vadd.f32 %v249_v55, %v248_v54 }
 0x22f   :  { %v251_v0 = vrot.slane %v250_v56, 1 }
 0x231   :  { %v252_v57 = vadd.f32 %v251_v0, %v250_v56 }
 0x233   :  { %v253_v58 = vmul.f32 0.125, %v252_v57 }
 0x235   :  { %v254_v59 = vadd.f32 1e-05, %v253_v58 }
 0x237   :  { %649 = vrsqrt.f32 %v254_v59 }
 0x241   :  { %v650_v61 = vpop.eup %649 }
 0x242   :  { %v256_v62 = vmul.f32 %v650_v61, %v166_v60 }
 0x244   :  { %v260_v63 = vrot.slane %v256_v62, %v770_v10 }
 0x246   :  { %v261_v2 = vmul.f32 %v260_v63, %v245_v51 }
 0x248   :  { %v266_v3 = vadd.f32 %v409_v1, %v261_v2 }
 0x24a   :  { %v267_v4 = vmax.f32 %v266_v3, 0.0 }
 0x24c   :  { %566 = vmatmul.mubr.f32.vlgmr.msra.gmra.mrb[2].mxu0 %v267_v4 }
 0x31f   :  { %v353_v5 = vpop.f32.mrb[2].mxu0 }
 0x320   :  { %v357_v6 = vrot.slane %v353_v5, 4  ;;  %v567_v7 = vpop.f32.mrb[3].mxu0 }
 0x322   :  { %v358_v8 = vadd.f32 %v357_v6, %v353_v5 }
 0x324   :  { %v359_v9 = vrot.slane %v358_v8, 2 }
 0x326   :  { %v360_v11 = vadd.f32 %v359_v9, %v358_v8 }
 0x328   :  { %v361_v12 = vrot.slane %v360_v11, 1 }
 0x32a   :  { %v362_v13 = vadd.f32 %v361_v12, %v360_v11 }
 0x32c   :  { %v363_v14 = vmul.f32 0.125, %v362_v13 }
 0x32e   :  { %v364_v15 = vsub.f32 %v353_v5, %v363_v14 }
 0x330   :  { %v365_v16 = vmul.f32 %v364_v15, %v364_v15 }
 0x332   :  { %v366_v17 = vrot.slane %v365_v16, 4 }
 0x334   :  { %v367_v18 = vadd.f32 %v366_v17, %v365_v16 }
 0x336   :  { %v368_v19 = vrot.slane %v367_v18, 2 }
 0x338   :  { %v369_v20 = vadd.f32 %v368_v19, %v367_v18 }
 0x33a   :  { %v370_v21 = vrot.slane %v369_v20, 1 }
 0x33c   :  { %v371_v22 = vadd.f32 %v370_v21, %v369_v20 }
 0x33e   :  { %v372_v23 = vmul.f32 0.125, %v371_v22 }
 0x340   :  { %v373_v24 = vadd.f32 1e-05, %v372_v23 }
 0x342   :  { %651 = vrsqrt.f32 %v373_v24 }
 0x34c   :  { %v652_v26 = vpop.eup %651 }
 0x34d   :  { %v375_v27 = vmul.f32 %v652_v26, %v285_v25 }
 0x34f   :  { %v379_v28 = vrot.slane %v375_v27, %v770_v10 }
 0x351   :  { %v380_v30 = vmul.f32 %v379_v28, %v364_v15 }
 0x353   :  { %v385_v31 = vadd.f32 %v410_v29, %v380_v30 }
 0x355   :  { %v411_v32 = vmul.f32 -1.442695, %v385_v31 }
 0x357   :  { %653 = vpow2.f32 %v411_v32 }
 0x361   :  { %v654_v33 = vpop.eup %653 }
 0x362   :  { %v389_v34 = vadd.f32 1.0, %v654_v33 }
 0x364   :  { %655 = vrcp.f32 %v389_v34 }
 0x36e   :  { %v656_v35 = vpop.eup %655 }
 0x36f   :  { %392 = vst [vmem:[#allocation5] sm:$0xff] %v656_v35 }
 0x370   :  { %690 = shalt.err (!%p687_p12)
}
 0x371   :  { %s691_s15 = scalar_lea.hbm %s812_s3, 128 }
 0x372   :  { %p692_p13 = scmp.ne.s32.totalorder %s812_s3, %s691_s15  ;;  %p695_p0 = scmp.lt.u32.totalorder %s691_s15, %s812_s3 }
 0x374   :  { %p697_p1 = pnand %p695_p0, %p692_p13 }
 0x376   :  { %700 = shalt.err (!%p697_p1)
}
 0x377   :  { %402 = dma.vmem_to_hbm [thread:$0]  %s400_s12, 128, %s812_s3, [#allocation4]  }
 0x378   :  { %703 = dma.done.wait [#allocation4], 128  }
 0x379   :  { %704 = vsyncadd [#allocation4], 4294967168 }
 0x37a   :  { %406 = vsyncpa [#allocation3], 1 }
 0x37b   :  { %407 = vsyncpa [#allocation4], 1 }

</bundles_post_ra>
